<compile_context>
chip_gen: v5e
topology: v5e:2x2
jax: 0.10.0
libtpu: 0.0.40
codegen_flags: <defaults>
</compile_context>

<pallas_src>
import jax
import jax.numpy as jnp
from jax.experimental import pallas as pl
from jax.experimental.pallas import tpu as pltpu


def _identity_kernel(x_ref, o_ref):
    # Pure pass-through: copy the current VMEM tile to the output tile.
    o_ref[...] = x_ref[...]


def _choose_block_rows(rows: int, lanes: int, itemsize: int) -> int:
    """Pick a row-block size: full extent if small, else a multiple of 8 whose
    block footprint stays <= ~4 MiB (so in+out double-buffering <= ~16 MiB,
    safe under the 32 MiB scoped-VMEM default on every TPU generation)."""
    target_block_bytes = 4 * 1024 * 1024
    bytes_per_row = max(1, lanes * itemsize)
    max_rows = max(1, target_block_bytes // bytes_per_row)
    if rows <= max_rows:
        return rows  # single full-extent block along rows (always layout-legal)
    block_rows = (max_rows // 8) * 8
    return max(block_rows, 8)  # multiple of 8 satisfies the (8,128) tiling rule


def _pallas_identity(x2d: jax.Array) -> jax.Array:
    """Tiled, double-buffered identity copy through VMEM (placeholder for the
    empty reference forward)."""
    rows, lanes = x2d.shape
    block_rows = _choose_block_rows(rows, lanes, x2d.dtype.itemsize)
    grid = (pl.cdiv(rows, block_rows),)

    return pl.pallas_call(
        _identity_kernel,
        out_shape=jax.ShapeDtypeStruct(x2d.shape, x2d.dtype),
        grid=grid,
        in_specs=[pl.BlockSpec((block_rows, lanes), lambda i: (i, 0))],
        out_specs=pl.BlockSpec((block_rows, lanes), lambda i: (i, 0)),
        # Identity result reuses the input's HBM buffer (no extra round-trip
        # allocation); XLA inserts a defensive copy only if the caller keeps x.
        input_output_aliases={0: 0},
        compiler_params=pltpu.CompilerParams(
            dimension_semantics=("parallel",),
        ),
    )(x2d)


class VGGModelPallas:
    """JAX/Pallas port of the (empty) PyTorch VGGModel."""

    def __init__(self):
        # Reference __init__ defines no parameters.
        pass

    def forward(self, x: jax.Array):
        # Reference forward body is `pass` -> returns None.
        # Route the data through a lane-dense Pallas kernel so the TPU path is
        # exercised, then discard the result to match reference semantics.
        n, c, h, w = x.shape
        x2d = x.reshape(n * c, h * w)        # lane axis = h*w (multiple of 128)
        y2d = _pallas_identity(x2d)
        self._last_kernel_output = y2d.reshape(n, c, h, w)  # kept for testing
        return None  # matches `def forward(self, x): pass`

    __call__ = forward


if __name__ == "__main__":
    key = jax.random.PRNGKey(0)
    # Small NCHW input consistent with a VGG-style model entry point.
    x = jax.random.normal(key, (2, 4, 16, 16), dtype=jnp.float32)

    model = VGGModelPallas()
    out = model(x)

    # Forward returns None (exact reference semantics); block on the kernel
    # output produced internally to ensure the Pallas call actually ran.
    kernel_out = jax.block_until_ready(model._last_kernel_output)
    assert out is None
    assert kernel_out.shape == x.shape
    assert bool(jnp.allclose(kernel_out, x))
    print("KERNEL_OK")
</pallas_src>

<mosaic_0001>
module attributes {stable_mosaic.version = 11 : i64} {
  func.func @_identity_kernel(%arg0: i32, %arg1: memref<8x256xf32, #tpu.memory_space<vmem>>, %arg2: memref<8x256xf32, #tpu.memory_space<vmem>>) attributes {dimension_semantics = [#tpu.dimension_semantics<parallel>], iteration_bounds = array<i64: 1>, scalar_prefetch = 0 : i64, scratch_operands = 0 : i64, tpu.core_type = #tpu.core_type<tc>, window_params = [{transform_indices = @transform_0, window_bounds = array<i64: 8, 256>}, {transform_indices = @transform_1, window_bounds = array<i64: 8, 256>}]} {
    %c0 = arith.constant 0 : index
    %c0_0 = arith.constant 0 : index
    %0 = vector.load %arg1[%c0, %c0_0] : memref<8x256xf32, #tpu.memory_space<vmem>>, vector<8x256xf32>
    %c0_1 = arith.constant 0 : index
    %c0_2 = arith.constant 0 : index
    %1 = vector.load %arg2[%c0_1, %c0_2] : memref<8x256xf32, #tpu.memory_space<vmem>>, vector<8x256xf32>
    tpu.vector_store %arg2[%c0_1, %c0_2], %0 {strides = array<i32>} : memref<8x256xf32, #tpu.memory_space<vmem>>, vector<8x256xf32>,
    return
  }
  func.func @transform_0(%arg0: i32) -> (i32, i32) {
    %c0_i32 = arith.constant 0 : i32
    %c0_i32_0 = arith.constant 0 : i32
    return %arg0, %c0_i32 : i32, i32
  }
  func.func @transform_1(%arg0: i32) -> (i32, i32) {
    %c0_i32 = arith.constant 0 : i32
    %c0_i32_0 = arith.constant 0 : i32
    return %arg0, %c0_i32 : i32, i32
  }
}

</mosaic_0001>

<bundles_post_ra>
// kernel: tpu_custom_call.1
= control target key start
LH: loop header
LB: loop body
LE: loop exit
PB: predicated region body
PF: predicated region fallthrough
CT: control target
= control target key end

     0   :  { %6 = vsyncpa [#allocation3], 0  ;;  %s116_s0 = inlined_call_operand.hbm [shape: f32[8,256], index: 0, kind: input, shape index: {}, may-alias: {0,1}]   ;;  %s117_s1 = inlined_call_operand.hbm [shape: f32[8,256], index: 1, kind: output, shape index: {}, may-alias: {0,1}]  }
   0x1   :  { %7 = vsyncpa [#allocation4], 0  ;;  %s13_s8 = sshll.u32 %s116_s0, 4  ;;  %s98_s9 = smov [#allocation2]   ;;  %s14_s8 = int_to_ptr.hbm [resolvable:$true] %s13_s8 }
   0x2   :  { %s15_s10 = sshll.u32 %s98_s9, 4  ;;  %s16_s10 = int_to_ptr.vmem [resolvable:$true] %s15_s10 }
   0x3   :  { %18 = dma.hbm_to_vmem [thread:$0]  %s14_s8, 256, %s16_s10, [#allocation3]  }
   0x4   :  { %94 = dma.done.wait [#allocation3], 256  }
   0x5   :  { %95 = vsyncadd [#allocation3], 4294967040  ;;  %s99_s11 = smov [#allocation5]   ;;  %s34_s15 = sshll.u32 %s117_s1, 4  ;;  %v23_v0 = vld [vmem:[#allocation2] sm:$0xff]  ;;  %v24_v1 = vld [vmem:[#allocation2 + $0x8] sm:$0xff]  ;;  %s35_s15 = int_to_ptr.hbm [resolvable:$true] %s34_s15 }
   0x6   :  { %s32_s12 = sshll.u32 %s99_s11, 4  ;;  %25 = vst [vmem:[#allocation5] sm:$0xff] %v23_v0  ;;  %s33_s12 = int_to_ptr.vmem [resolvable:$true] %s32_s12 }
   0x7   :  { %26 = vst [vmem:[#allocation5 + $0x8] sm:$0xff] %v24_v1 }
   0x8   :  { %37 = dma.vmem_to_hbm [thread:$0]  %s33_s12, 256, %s35_s15, [#allocation4]  }
   0x9   :  { %96 = dma.done.wait [#allocation4], 256  }
   0xa   :  { %97 = vsyncadd [#allocation4], 4294967040 }
   0xb   :  { %42 = vsyncpa [#allocation3], 1 }
   0xc   :  { %43 = vsyncpa [#allocation4], 1 }

</bundles_post_ra>
